<compile_context>
chip_gen: v7x
topology: tpu7x:2x2x1
jax: 0.10.0
libtpu: 0.0.40
codegen_flags: <defaults>
</compile_context>

<pallas_src>
import functools

import jax
import jax.numpy as jnp
from jax.experimental import pallas as pl
from jax.experimental.pallas import tpu as pltpu


def _round_up(x, m):
    return (x + m - 1) // m * m


def rotation_loss_kernel(x_ref, t_ref, out_ref, acc_ref, *, D, M):
    # x_ref/t_ref : (tb, tn) tiles of the flattened (B, N*D) inputs (native dtype)
    # out_ref     : (tb, 1)  f32 per-batch-row norm, written once at the last k step
    # acc_ref     : (tb, 1)  f32 running per-row sum of diff^4
    k = pl.program_id(1)

    @pl.when(k == 0)
    def _():
        acc_ref[...] = jnp.zeros_like(acc_ref)

    tb, tn = x_ref.shape
    # Global column index of every lane in this block.
    col = jax.lax.broadcasted_iota(jnp.int32, (tb, tn), 1) + k * tn
    # Keep only component 3 of each point, and mask the out-of-bounds tail of the
    # last k block (its contents are unspecified and must not poison the sum).
    mask = (col % D == 3) & (col < M)

    # Cast inside the kernel (cheap VPU op) so HBM traffic stays in the native dtype.
    diff = x_ref[...].astype(jnp.float32) - t_ref[...].astype(jnp.float32)
    d2 = diff * diff                                   # (input - target)^2
    d4 = jnp.where(mask, d2 * d2, 0.0)                 # diff^4, component 3 only
    acc_ref[...] += jnp.sum(d4, axis=1, keepdims=True)  # XLU reduce; acc is (tb, 1)

    @pl.when(k == pl.num_programs(1) - 1)
    def _():
        out_ref[...] = jnp.sqrt(acc_ref[...])


@functools.partial(jax.jit, static_argnames=("tb_cap", "tn_cap"))
def rotation_loss(inp, tgt, *, tb_cap=64, tn_cap=8192):
    assert inp.shape == tgt.shape and inp.ndim == 3 and inp.shape[-1] >= 4
    B, N, D = inp.shape
    M = N * D

    # Free reshape (collapse of contiguous trailing dims) -- no extra HBM pass.
    x = inp.reshape(B, M)
    t = tgt.reshape(B, M)

    # Lane (reduction) tile: a multiple of 128 unless a whole row fits in one block.
    tn = M if M <= tn_cap else tn_cap
    # Batch tile: full B when tiny, otherwise a multiple of 8 that yields >= 2
    # batch blocks so the "parallel" axis can be split across TensorCores (v7x).
    tb = B if B <= 8 else min(tb_cap, _round_up((B + 1) // 2, 8))

    grid = (pl.cdiv(B, tb), pl.cdiv(M, tn))

    kernel = functools.partial(rotation_loss_kernel, D=D, M=M)

    itemsize = jnp.dtype(inp.dtype).itemsize
    cost = pl.CostEstimate(
        flops=4 * B * N,
        transcendentals=B,
        bytes_accessed=2 * B * M * itemsize + 4 * B,
    )

    per_row_norm = pl.pallas_call(
        kernel,
        out_shape=jax.ShapeDtypeStruct((B, 1), jnp.float32),
        grid_spec=pltpu.PrefetchScalarGridSpec(
            num_scalar_prefetch=0,
            grid=grid,
            in_specs=[
                pl.BlockSpec((tb, tn), lambda i, k: (i, k)),
                pl.BlockSpec((tb, tn), lambda i, k: (i, k)),
            ],
            out_specs=pl.BlockSpec((tb, 1), lambda i, k: (i, 0)),
            scratch_shapes=[pltpu.VMEM((tb, 1), jnp.float32)],
        ),
        compiler_params=pltpu.CompilerParams(
            dimension_semantics=("parallel", "arbitrary"),
        ),
        cost_estimate=cost,
    )(x, t)

    # Tiny final batch mean.
    return jnp.mean(per_row_norm)


def rotation_loss_ref(inp, tgt):
    temp = (inp - tgt) ** 2
    temp2 = temp[:, :, 3]
    temp3 = jnp.sqrt(jnp.sum(temp2 * temp2, axis=1))
    return jnp.mean(temp3)


if __name__ == "__main__":
    key = jax.random.PRNGKey(0)

    # Small shape consistent with the module: (batch=2, points=8, components=4).
    k1, k2 = jax.random.split(key)
    B, N, D = 2, 8, 4
    inp = jax.random.normal(k1, (B, N, D), dtype=jnp.float32)
    tgt = jax.random.normal(k2, (B, N, D), dtype=jnp.float32)

    out = rotation_loss(inp, tgt)
    jax.block_until_ready(out)
    ref = rotation_loss_ref(inp, tgt)
    assert jnp.allclose(out, ref, rtol=1e-5, atol=1e-6), (out, ref)

    # Second small shape exercising D=5, partial batch blocks, a multi-step k grid
    # and the lane-tail mask (M = 1500 not a multiple of tn = 256).
    k3, k4 = jax.random.split(k2)
    inp2 = jax.random.normal(k3, (20, 300, 5), dtype=jnp.float32)
    tgt2 = jax.random.normal(k4, (20, 300, 5), dtype=jnp.float32)
    out2 = rotation_loss(inp2, tgt2, tb_cap=8, tn_cap=256)
    jax.block_until_ready(out2)
    ref2 = rotation_loss_ref(inp2, tgt2)
    assert jnp.allclose(out2, ref2, rtol=1e-5, atol=1e-5), (out2, ref2)

    print("KERNEL_OK")
</pallas_src>

<mosaic_0001>
module attributes {stable_mosaic.version = 11 : i64} {
  func.func @rotation_loss_kernel(%arg0: i32, %arg1: i32, %arg2: memref<2x32xf32, #tpu.memory_space<vmem>>, %arg3: memref<2x32xf32, #tpu.memory_space<vmem>>, %arg4: memref<2x1xf32, #tpu.memory_space<vmem>>, %arg5: memref<2x1xf32, #tpu.memory_space<vmem>>) attributes {dimension_semantics = [#tpu.dimension_semantics<parallel>, #tpu.dimension_semantics<arbitrary>], iteration_bounds = array<i64: 1, 1>, scalar_prefetch = 0 : i64, scratch_operands = 1 : i64, tpu.core_type = #tpu.core_type<tc>, window_params = [{transform_indices = @transform_0, window_bounds = array<i64: 2, 32>}, {transform_indices = @transform_1, window_bounds = array<i64: 2, 32>}, {transform_indices = @transform_2, window_bounds = array<i64: 2, 1>}]} {
    %c0_i32 = arith.constant 0 : i32
    %0 = arith.cmpi eq, %arg1, %c0_i32 : i32
    %1 = arith.extui %0 : i1 to i32
    %c0_i32_0 = arith.constant 0 : i32
    %2 = arith.cmpi ne, %1, %c0_i32_0 : i32
    scf.if %2 {
      %cst_16 = arith.constant 0.000000e+00 : f32
      %43 = vector.broadcast %cst_16 : f32 to vector<2x1xf32>
      %c0_17 = arith.constant 0 : index
      %c0_18 = arith.constant 0 : index
      %44 = vector.load %arg5[%c0_17, %c0_18] : memref<2x1xf32, #tpu.memory_space<vmem>>, vector<2x1xf32>
      tpu.vector_store %arg5[%c0_17, %c0_18], %43 {strides = array<i32>} : memref<2x1xf32, #tpu.memory_space<vmem>>, vector<2x1xf32>,
    } else {
    }
    %3 = tpu.iota {dimensions = array<i32: 1>} : vector<2x32xi32>
    %c32_i32 = arith.constant 32 : i32
    %4 = arith.muli %arg1, %c32_i32 : i32
    %5 = vector.broadcast %4 : i32 to vector<2x32xi32>
    %6 = arith.addi %3, %5 : vector<2x32xi32>
    %c4_i32 = arith.constant 4 : i32
    %c0_i32_1 = arith.constant 0 : i32
    %7 = arith.cmpi eq, %c4_i32, %c0_i32_1 : i32
    %c1_i32 = arith.constant 1 : i32
    %8 = arith.select %7, %c1_i32, %c4_i32 : i32
    %9 = vector.broadcast %8 : i32 to vector<2x32xi32>
    %10 = arith.remsi %6, %9 : vector<2x32xi32>
    %c0_i32_2 = arith.constant 0 : i32
    %11 = vector.broadcast %c0_i32_2 : i32 to vector<2x32xi32>
    %12 = arith.cmpi ne, %10, %11 : vector<2x32xi32>
    %c0_i32_3 = arith.constant 0 : i32
    %13 = vector.broadcast %c0_i32_3 : i32 to vector<2x32xi32>
    %14 = arith.cmpi slt, %10, %13 : vector<2x32xi32>
    %c0_i32_4 = arith.constant 0 : i32
    %15 = arith.cmpi slt, %8, %c0_i32_4 : i32
    %16 = vector.broadcast %15 : i1 to vector<2x32xi1>
    %17 = vector.broadcast %16 : vector<2x32xi1> to vector<2x32xi1>
    %18 = arith.xori %14, %17 : vector<2x32xi1>
    %19 = arith.andi %18, %12 : vector<2x32xi1>
    %20 = vector.broadcast %8 : i32 to vector<2x32xi32>
    %21 = arith.addi %10, %20 : vector<2x32xi32>
    %22 = arith.select %19, %21, %10 : vector<2x32xi1>, vector<2x32xi32>
    %c3_i32 = arith.constant 3 : i32
    %23 = vector.broadcast %c3_i32 : i32 to vector<2x32xi32>
    %24 = arith.cmpi eq, %22, %23 : vector<2x32xi32>
    %c32_i32_5 = arith.constant 32 : i32
    %25 = vector.broadcast %c32_i32_5 : i32 to vector<2x32xi32>
    %26 = arith.cmpi slt, %6, %25 : vector<2x32xi32>
    %27 = arith.andi %24, %26 : vector<2x32xi1>
    %c0 = arith.constant 0 : index
    %c0_6 = arith.constant 0 : index
    %28 = vector.load %arg2[%c0, %c0_6] : memref<2x32xf32, #tpu.memory_space<vmem>>, vector<2x32xf32>
    %c0_7 = arith.constant 0 : index
    %c0_8 = arith.constant 0 : index
    %29 = vector.load %arg3[%c0_7, %c0_8] : memref<2x32xf32, #tpu.memory_space<vmem>>, vector<2x32xf32>
    %30 = arith.subf %28, %29 : vector<2x32xf32>
    %31 = arith.mulf %30, %30 : vector<2x32xf32>
    %32 = arith.mulf %31, %31 : vector<2x32xf32>
    %cst = arith.constant 0.000000e+00 : f32
    %33 = vector.broadcast %cst : f32 to vector<2x32xf32>
    %34 = arith.select %27, %32, %33 : vector<2x32xi1>, vector<2x32xf32>
    %c0_9 = arith.constant 0 : index
    %c0_10 = arith.constant 0 : index
    %35 = vector.load %arg5[%c0_9, %c0_10] : memref<2x1xf32, #tpu.memory_space<vmem>>, vector<2x1xf32>
    %cst_11 = arith.constant dense<0.000000e+00> : vector<2xf32>
    %36 = vector.multi_reduction <add>, %34, %cst_11 [1] : vector<2x32xf32> to vector<2xf32>
    %37 = vector.shape_cast %36 : vector<2xf32> to vector<2x1xf32>
    %38 = arith.addf %35, %37 : vector<2x1xf32>
    %c0_12 = arith.constant 0 : index
    %c0_13 = arith.constant 0 : index
    %39 = vector.load %arg5[%c0_12, %c0_13] : memref<2x1xf32, #tpu.memory_space<vmem>>, vector<2x1xf32>
    tpu.vector_store %arg5[%c0_12, %c0_13], %38 {strides = array<i32>} : memref<2x1xf32, #tpu.memory_space<vmem>>, vector<2x1xf32>,
    %c0_i32_14 = arith.constant 0 : i32
    %40 = arith.cmpi eq, %arg1, %c0_i32_14 : i32
    %41 = arith.extui %40 : i1 to i32
    %c0_i32_15 = arith.constant 0 : i32
    %42 = arith.cmpi ne, %41, %c0_i32_15 : i32
    scf.if %42 {
      %c0_16 = arith.constant 0 : index
      %c0_17 = arith.constant 0 : index
      %43 = vector.load %arg5[%c0_16, %c0_17] : memref<2x1xf32, #tpu.memory_space<vmem>>, vector<2x1xf32>
      %44 = math.sqrt %43 : vector<2x1xf32>
      %c0_18 = arith.constant 0 : index
      %c0_19 = arith.constant 0 : index
      %45 = vector.load %arg4[%c0_18, %c0_19] : memref<2x1xf32, #tpu.memory_space<vmem>>, vector<2x1xf32>
      tpu.vector_store %arg4[%c0_18, %c0_19], %44 {strides = array<i32>} : memref<2x1xf32, #tpu.memory_space<vmem>>, vector<2x1xf32>,
    } else {
    }
    return
  }
  func.func @transform_0(%arg0: i32, %arg1: i32) -> (i32, i32) {
    %c0_i32 = arith.constant 0 : i32
    return %arg0, %arg1 : i32, i32
  }
  func.func @transform_1(%arg0: i32, %arg1: i32) -> (i32, i32) {
    %c0_i32 = arith.constant 0 : i32
    return %arg0, %arg1 : i32, i32
  }
  func.func @transform_2(%arg0: i32, %arg1: i32) -> (i32, i32) {
    %c0_i32 = arith.constant 0 : i32
    %c0_i32_0 = arith.constant 0 : i32
    return %arg0, %c0_i32 : i32, i32
  }
}

</mosaic_0001>

<bundles_post_ra>
// kernel: rotation_loss.1
= control target key start
LH: loop header
LB: loop body
LE: loop exit
PB: predicated region body
PF: predicated region fallthrough
CT: control target
= control target key end

     0   :  { %v17_v0 = vlaneseq  ;;  %vm15_vm0 = vcmask 1024   ;;  %v70_v3 = vmov 0.0   ;;  %vm44_vm3 = vcmask 254976   ;;  %s98_s0 = inlined_call_operand.vmem [shape: f32[2,32], index: 0, kind: input, shape index: {}]   ;;  %s99_s1 = inlined_call_operand.vmem [shape: f32[2,32], index: 1, kind: input, shape index: {}]   ;;  %s100_s2 = inlined_call_operand.vmem [shape: f32[2,1], index: 2, kind: output, shape index: {}]  }
   0x1   :  { %v37_v1 = vld [vmem:[%s98_s0] sm:$0x3]  ;;  %16 = vst.msk [vmem:[#allocation2] sm:$0x3] %vm15_vm0, %v70_v3 }
   0x2   :  { %v38_v2 = vld [vmem:[%s99_s1] sm:$0x3]  ;;  %v18_v4 = vand.u32 127, %v17_v0 }
   0x3   :  { %v39_v5 = vsub.f32 %v37_v1, %v38_v2 }
   0x4   :  { %v26_v6 = vand.u32 3, %v18_v4  ;;  %vm35_vm1 = vcmp.lt.s32.totalorder %v18_v4, 32 }
   0x5   :  { %v40_v7 = vmul.f32 %v39_v5, %v39_v5 }
   0x6   :  { %vm34_vm2 = vcmp.eq.s32.totalorder %v26_v6, 3 }
   0x7   :  { %v41_v8 = vmul.f32 %v40_v7, %v40_v7  ;;  %vm36_vm4 = vmand %vm34_vm2, %vm35_vm1 }
   0x8   :  { %v43_v11 = vld [vmem:[#allocation2] sm:$0x3] }
   0x9   :  { %v42_v9 = vsel %vm36_vm4, %v41_v8, 0.0 }
   0xa   :  { %v45_v10 = vsel %vm44_vm3, %v42_v9, 0.0 }
   0xb   :  { %46 = vadd.xlane.f32.xlu0 %v45_v10 }
  0x98   :  { %v47_v12 = vpop.xlane.xlu0 %46 }
  0x99   :  { %v48_v13 = vadd.f32 %v47_v12, %v43_v11 }
  0x9b   :  { %50 = vst.msk [vmem:[#allocation2] sm:$0x3] %vm15_vm0, %v48_v13 }
  0xa2   :  { %v54_v14 = vld [vmem:[#allocation2] sm:$0x3] }
  0xa3   :  { %68 = vrsqrt.f32 %v54_v14  ;;  %vm57_vm5 = vcmp.eq.f32.partialorder %v54_v14, inf  ;;  %v60_v17 = vand.u32 2147483648, %v54_v14  ;;  %vm59_vm6 = vcmp.eq.f32.partialorder %v54_v14, 0.0 }
  0xad   :  { %v69_v15 = vpop.eup %68 }
  0xae   :  { %v56_v16 = vmul.f32 %v69_v15, %v54_v14 }
  0xb0   :  { %v58_v18 = vsel %vm57_vm5, %v54_v14, %v56_v16 }
  0xb1   :  { %v61_v19 = vsel %vm59_vm6, %v60_v17, %v58_v18 }
  0xb2   :  { %62 = vst.msk [vmem:[%s100_s2] sm:$0x3] %vm15_vm0, %v61_v19 }

</bundles_post_ra>
